<compile_context>
chip_gen: v5e
topology: v5e:2x2
jax: 0.10.0
libtpu: 0.0.40
codegen_flags: <defaults>
</compile_context>

<pallas_src>
import functools

import jax
import jax.numpy as jnp
from jax import lax
from jax.experimental import pallas as pl
from jax.experimental.pallas import tpu as pltpu


def _focal_cosine_kernel(x_ref, t_ref, out_ref, *, alpha, gamma, batch,
                         tile_rows, needs_mask):
    x = x_ref[...].astype(jnp.float32)            # (TB, C) upcast once
    t = t_ref[...]                                # (TB, 1) int32
    TB, C = x.shape

    # Fused one-hot gather: x[i, t[i]] without materializing the one-hot.
    col = lax.broadcasted_iota(jnp.int32, (TB, C), 1)
    x_at_t = jnp.sum(jnp.where(col == t, x, 0.0), axis=-1, keepdims=True)  # (TB,1)
    sumsq = jnp.sum(x * x, axis=-1, keepdims=True)                         # (TB,1)

    # eps clamps applied on sumsq (eps^2) == clamping the norm at eps.
    inv_norm_cos = lax.rsqrt(jnp.maximum(sumsq, 1e-16))   # 1 / max(||x||, 1e-8)
    inv_norm = lax.rsqrt(jnp.maximum(sumsq, 1e-24))       # 1 / max(||x||, 1e-12)

    # --- cosine embedding loss with y = +1 : 1 - cos_sim(x, one_hot) ---
    one_minus_cos = 1.0 - x_at_t * inv_norm_cos           # (TB, 1)

    # --- per-sample cross entropy on L2-normalized logits ---
    # xn in [-1, 1] => exp(xn) <= e, so the usual max-subtraction is skipped.
    xn = x * inv_norm
    sum_exp = jnp.sum(jnp.exp(xn), axis=-1, keepdims=True)  # (TB, 1)
    xn_at_t = x_at_t * inv_norm
    ce = jnp.log(sum_exp) - xn_at_t                          # (TB, 1)
    pt = jnp.exp(-ce)                                        # matches reference exactly
    focal = alpha * (1.0 - pt) ** gamma * ce                 # int gamma -> integer_pow

    # Ragged last tile: padded rows carry undefined data, but everything above
    # is strictly per-row, so zeroing the two (TB,1) results here is sufficient.
    if needs_mask:
        i = pl.program_id(0)
        row = lax.broadcasted_iota(jnp.int32, (TB, 1), 0) + i * tile_rows
        valid = row < batch
        one_minus_cos = jnp.where(valid, one_minus_cos, 0.0)
        focal = jnp.where(valid, focal, 0.0)

    cos_psum = jnp.sum(one_minus_cos)
    foc_psum = jnp.sum(focal)

    # Single lane-dense (1, 2, 128) unmasked store of both per-tile partials:
    # sub-row 0 = sum(1 - cos), sub-row 1 = sum(focal).
    sel = lax.broadcasted_iota(jnp.int32, out_ref.shape, 1) == 0
    out_ref[...] = jnp.where(sel, cos_psum, foc_psum)


def _choose_tile_rows(batch, n_classes, max_tile_rows=None):
    # Size the tile from the f32 working set: the kernel keeps a handful of
    # full-size f32 intermediates (x, xn, exp(xn)) live, plus the
    # double-buffered input tile -> target ~2 MiB of raw f32 tile so the total
    # stays well inside the 32 MiB default scoped VMEM (and v7x's 64 MiB
    # physical VMEM) without raising vmem_limit_bytes.
    target_bytes = 2 * 1024 * 1024
    tb = target_bytes // max(1, n_classes * 4)
    tb = min(tb, 16384)                      # per-step overhead already amortized
    if max_tile_rows is not None:
        tb = min(tb, max_tile_rows)
    tb = max(8, (int(tb) // 8) * 8)          # multiple of 8 sublanes
    if batch > 16:
        # Prefer >=2 tiles so both v7x TensorCores get work under "parallel".
        half = (((batch + 1) // 2) + 7) // 8 * 8
        tb = min(tb, half)
    if tb >= batch:
        return batch                         # single full block (always legal)
    return tb


def focal_cosine_loss(x, target, *, alpha=1.0, gamma=2, xent=0.1,
                      max_tile_rows=None):
    """x: (B, C) float logits (f32 or bf16), target: (B,) int class indices.

    Tip (v5e/v6e): casting x to bf16 before calling halves HBM traffic; the
    kernel upcasts internally, so only input bandwidth (and precision) change.
    """
    B, C = x.shape
    if isinstance(gamma, float) and float(gamma).is_integer():
        gamma = int(gamma)                   # keep (1-pt)**gamma off the EUP
    t2 = target.astype(jnp.int32).reshape(B, 1)

    TB = _choose_tile_rows(B, C, max_tile_rows)
    num_tiles = pl.cdiv(B, TB)
    needs_mask = (B % TB) != 0

    kernel = functools.partial(
        _focal_cosine_kernel, alpha=float(alpha), gamma=gamma, batch=B,
        tile_rows=TB, needs_mask=needs_mask)

    parts = pl.pallas_call(
        kernel,
        grid=(num_tiles,),
        out_shape=jax.ShapeDtypeStruct((num_tiles, 2, 128), jnp.float32),
        in_specs=[
            pl.BlockSpec((TB, C), lambda i: (i, 0)),
            pl.BlockSpec((TB, 1), lambda i: (i, 0)),
        ],
        out_specs=pl.BlockSpec((1, 2, 128), lambda i: (i, 0, 0)),
        compiler_params=pltpu.CompilerParams(
            dimension_semantics=("parallel",)),   # shards across v7x's 2 TCs
    )(x, t2)

    # Tiny final reduction in JAX: sum per-tile partials, divide by TRUE batch.
    sums = jnp.sum(parts[:, :, 0], axis=0)        # (2,) -> [sum(1-cos), sum(focal)]
    cosine_loss = sums[0] / B
    focal_loss = sums[1] / B
    return cosine_loss + xent * focal_loss


def _reference(x, target, alpha=1.0, gamma=2, xent=0.1):
    """Pure-JAX reference mirroring the PyTorch module (for sanity check)."""
    B, C = x.shape
    xf = x.astype(jnp.float32)
    onehot = jax.nn.one_hot(target, C, dtype=jnp.float32)
    norm = jnp.linalg.norm(xf, axis=-1)
    cos = jnp.sum(xf * onehot, axis=-1) / jnp.maximum(norm, 1e-8)
    cosine_loss = jnp.mean(1.0 - cos)
    xn = xf / jnp.maximum(norm, 1e-12)[:, None]
    logp = jax.nn.log_softmax(xn, axis=-1)
    ce = -jnp.take_along_axis(logp, target[:, None], axis=-1)[:, 0]
    pt = jnp.exp(-ce)
    focal = jnp.mean(alpha * (1.0 - pt) ** gamma * ce)
    return cosine_loss + xent * focal


if __name__ == "__main__":
    key = jax.random.PRNGKey(0)
    kx, kt, kx2, kt2 = jax.random.split(key, 4)

    # Test 1: small single-tile case (batch=8, num_classes=16).
    B, C = 8, 16
    x = jax.random.normal(kx, (B, C), dtype=jnp.float32)
    target = jax.random.randint(kt, (B,), 0, C, dtype=jnp.int32)
    loss = focal_cosine_loss(x, target)
    jax.block_until_ready(loss)
    ref = _reference(x, target)
    assert jnp.allclose(loss, ref, atol=1e-5, rtol=1e-5), (loss, ref)

    # Test 2: multiple tiles with a ragged last tile, forced small tile
    # (mask path, 3 tiles of 8 rows covering batch=20).
    B2, C2 = 20, 16
    x2 = jax.random.normal(kx2, (B2, C2), dtype=jnp.float32)
    target2 = jax.random.randint(kt2, (B2,), 0, C2, dtype=jnp.int32)
    loss2 = focal_cosine_loss(x2, target2, max_tile_rows=8)
    jax.block_until_ready(loss2)
    ref2 = _reference(x2, target2)
    assert jnp.allclose(loss2, ref2, atol=1e-5, rtol=1e-5), (loss2, ref2)

    # Test 3: default auto tile sizing on batch>16 -> >=2 tiles, ragged last.
    loss3 = focal_cosine_loss(x2, target2)
    jax.block_until_ready(loss3)
    assert jnp.allclose(loss3, ref2, atol=1e-5, rtol=1e-5), (loss3, ref2)

    print("KERNEL_OK")
</pallas_src>

<mosaic_0001>
module attributes {stable_mosaic.version = 11 : i64} {
  func.func @_focal_cosine_kernel(%arg0: i32, %arg1: memref<8x16xf32, #tpu.memory_space<vmem>>, %arg2: memref<8x1xi32, #tpu.memory_space<vmem>>, %arg3: memref<1x2x128xf32, #tpu.memory_space<vmem>>) attributes {dimension_semantics = [#tpu.dimension_semantics<parallel>], iteration_bounds = array<i64: 1>, scalar_prefetch = 0 : i64, scratch_operands = 0 : i64, tpu.core_type = #tpu.core_type<tc>, window_params = [{transform_indices = @transform_0, window_bounds = array<i64: 8, 16>}, {transform_indices = @transform_1, window_bounds = array<i64: 8, 1>}, {transform_indices = @transform_2, window_bounds = array<i64: 1, 2, 128>}]} {
    %c0 = arith.constant 0 : index
    %c0_0 = arith.constant 0 : index
    %0 = vector.load %arg1[%c0, %c0_0] : memref<8x16xf32, #tpu.memory_space<vmem>>, vector<8x16xf32>
    %c0_1 = arith.constant 0 : index
    %c0_2 = arith.constant 0 : index
    %1 = vector.load %arg2[%c0_1, %c0_2] : memref<8x1xi32, #tpu.memory_space<vmem>>, vector<8x1xi32>
    %2 = tpu.iota {dimensions = array<i32: 1>} : vector<8x16xi32>
    %3 = vector.broadcast %1 : vector<8x1xi32> to vector<8x16xi32>
    %4 = arith.cmpi eq, %2, %3 : vector<8x16xi32>
    %cst = arith.constant 0.000000e+00 : f32
    %5 = vector.broadcast %cst : f32 to vector<8x16xf32>
    %6 = arith.select %4, %0, %5 : vector<8x16xi1>, vector<8x16xf32>
    %cst_3 = arith.constant dense<0.000000e+00> : vector<8xf32>
    %7 = vector.multi_reduction <add>, %6, %cst_3 [1] : vector<8x16xf32> to vector<8xf32>
    %8 = vector.shape_cast %7 : vector<8xf32> to vector<8x1xf32>
    %9 = arith.mulf %0, %0 : vector<8x16xf32>
    %cst_4 = arith.constant dense<0.000000e+00> : vector<8xf32>
    %10 = vector.multi_reduction <add>, %9, %cst_4 [1] : vector<8x16xf32> to vector<8xf32>
    %11 = vector.shape_cast %10 : vector<8xf32> to vector<8x1xf32>
    %cst_5 = arith.constant 1.000000e-16 : f32
    %12 = vector.broadcast %cst_5 : f32 to vector<8x1xf32>
    %13 = arith.maximumf %11, %12 : vector<8x1xf32>
    %14 = math.rsqrt %13 : vector<8x1xf32>
    %cst_6 = arith.constant 1.000000e-24 : f32
    %15 = vector.broadcast %cst_6 : f32 to vector<8x1xf32>
    %16 = arith.maximumf %11, %15 : vector<8x1xf32>
    %17 = math.rsqrt %16 : vector<8x1xf32>
    %18 = arith.mulf %8, %14 : vector<8x1xf32>
    %cst_7 = arith.constant 1.000000e+00 : f32
    %19 = vector.broadcast %cst_7 : f32 to vector<8x1xf32>
    %20 = arith.subf %19, %18 : vector<8x1xf32>
    %21 = vector.broadcast %17 : vector<8x1xf32> to vector<8x16xf32>
    %22 = arith.mulf %0, %21 : vector<8x16xf32>
    %23 = math.exp %22 : vector<8x16xf32>
    %cst_8 = arith.constant dense<0.000000e+00> : vector<8xf32>
    %24 = vector.multi_reduction <add>, %23, %cst_8 [1] : vector<8x16xf32> to vector<8xf32>
    %25 = vector.shape_cast %24 : vector<8xf32> to vector<8x1xf32>
    %26 = arith.mulf %8, %17 : vector<8x1xf32>
    %27 = math.log %25 : vector<8x1xf32>
    %28 = arith.subf %27, %26 : vector<8x1xf32>
    %cst_9 = arith.constant 0.000000e+00 : f32
    %29 = vector.broadcast %cst_9 : f32 to vector<8x1xf32>
    %30 = arith.subf %29, %28 : vector<8x1xf32>
    %31 = math.exp %30 : vector<8x1xf32>
    %cst_10 = arith.constant 1.000000e+00 : f32
    %32 = vector.broadcast %cst_10 : f32 to vector<8x1xf32>
    %33 = arith.subf %32, %31 : vector<8x1xf32>
    %34 = arith.mulf %33, %33 : vector<8x1xf32>
    %cst_11 = arith.constant 1.000000e+00 : f32
    %35 = vector.broadcast %cst_11 : f32 to vector<8x1xf32>
    %36 = arith.mulf %35, %34 : vector<8x1xf32>
    %37 = arith.mulf %36, %28 : vector<8x1xf32>
    %38 = vector.shape_cast %20 : vector<8x1xf32> to vector<1x8x1xf32>
    %cst_12 = arith.constant dense<0.000000e+00> : vector<1xf32>
    %39 = vector.multi_reduction <add>, %38, %cst_12 [1, 2] : vector<1x8x1xf32> to vector<1xf32>
    %40 = vector.shape_cast %39 : vector<1xf32> to vector<1x1x1xf32>
    %41 = vector.extract %40[0, 0, 0] : f32 from vector<1x1x1xf32>
    %42 = vector.shape_cast %37 : vector<8x1xf32> to vector<1x8x1xf32>
    %cst_13 = arith.constant dense<0.000000e+00> : vector<1xf32>
    %43 = vector.multi_reduction <add>, %42, %cst_13 [1, 2] : vector<1x8x1xf32> to vector<1xf32>
    %44 = vector.shape_cast %43 : vector<1xf32> to vector<1x1x1xf32>
    %45 = vector.extract %44[0, 0, 0] : f32 from vector<1x1x1xf32>
    %46 = tpu.iota {dimensions = array<i32: 1>} : vector<1x2x128xi32>
    %c0_i32 = arith.constant 0 : i32
    %47 = vector.broadcast %c0_i32 : i32 to vector<1x2x128xi32>
    %48 = arith.cmpi eq, %46, %47 : vector<1x2x128xi32>
    %49 = vector.broadcast %41 : f32 to vector<1x2x128xf32>
    %50 = vector.broadcast %45 : f32 to vector<1x2x128xf32>
    %51 = arith.select %48, %49, %50 : vector<1x2x128xi1>, vector<1x2x128xf32>
    %c0_14 = arith.constant 0 : index
    %c0_15 = arith.constant 0 : index
    %c0_16 = arith.constant 0 : index
    %52 = vector.load %arg3[%c0_14, %c0_15, %c0_16] : memref<1x2x128xf32, #tpu.memory_space<vmem>>, vector<1x2x128xf32>
    tpu.vector_store %arg3[%c0_14, %c0_15, %c0_16], %51 {strides = array<i32>} : memref<1x2x128xf32, #tpu.memory_space<vmem>>, vector<1x2x128xf32>,
    return
  }
  func.func @transform_0(%arg0: i32) -> (i32, i32) {
    %c0_i32 = arith.constant 0 : i32
    %c0_i32_0 = arith.constant 0 : i32
    return %arg0, %c0_i32 : i32, i32
  }
  func.func @transform_1(%arg0: i32) -> (i32, i32) {
    %c0_i32 = arith.constant 0 : i32
    %c0_i32_0 = arith.constant 0 : i32
    return %arg0, %c0_i32 : i32, i32
  }
  func.func @transform_2(%arg0: i32) -> (i32, i32, i32) {
    %c0_i32 = arith.constant 0 : i32
    %c0_i32_0 = arith.constant 0 : i32
    %c0_i32_1 = arith.constant 0 : i32
    return %arg0, %c0_i32, %c0_i32_0 : i32, i32, i32
  }
}

</mosaic_0001>

<bundles_post_ra>
// kernel: tpu_custom_call.1
= control target key start
LH: loop header
LB: loop body
LE: loop exit
PB: predicated region body
PF: predicated region fallthrough
CT: control target
= control target key end

     0   :  { %vm21_vm0 = vcmask 130048   ;;  %s185_s0 = inlined_call_operand.vmem [shape: f32[8,16], index: 0, kind: input, shape index: {}]   ;;  %s186_s1 = inlined_call_operand.vmem [shape: s32[8,1], index: 1, kind: input, shape index: {}]   ;;  %s187_s2 = inlined_call_operand.hbm [shape: f32[1,2,128], index: 2, kind: output, shape index: {}]  }
   0x1   :  { %v12_v0 = vld [vmem:[%s185_s0] sm:$0xff] }
   0x2   :  { %7 = vsyncpa [#allocation3], 0  ;;  %v25_v1 = vmul.f32 %v12_v0, %v12_v0  ;;  %v156_v2 = vmov 0   ;;  %v13_v4 = vld [vmem:[%s186_s1] sm:$0xff]  ;;  %v14_v16 = vlaneseq  ;;  %vm69_vm8 = vcmask 7168   ;;  %s157_s0 = smov [#allocation2]  }
   0x3   :  { %119 = vset.pattern.permute.xlu0 %v156_v2  ;;  %s102_s1 = sshll.u32 %s157_s0, 4  ;;  %s104_s16 = sshll.u32 %s187_s2, 4  ;;  %s103_s1 = int_to_ptr.vmem [resolvable:$true] %s102_s1  ;;  %s105_s16 = int_to_ptr.hbm [resolvable:$true] %s104_s16 }
   0x4   :  { %v26_v3 = vsel %vm21_vm0, %v25_v1, 0.0  ;;  %v15_v17 = vand.u32 127, %v14_v16  ;;  %v91_v61 = vshrl.u32 %v14_v16, 7 }
   0x5   :  { %27 = vadd.xlane.f32.xlu0 %v26_v3 }
   0x6   :  { %vm92_vm9 = vcmp.eq.s32.totalorder %v91_v61, 0 }
  0x19   :  { %17 = vperm.xlu0 %119, %v13_v4  }
  0x78   :  { %v28_v5 = vpop.xlane.xlu0 %27 }
  0x79   :  { %v40_v6 = vmax.f32 %v28_v5, 1e-24  ;;  %v29_v23 = vmax.f32 %v28_v5, 1e-16 }
  0x7b   :  { %120 = vrsqrt.f32 %v40_v6  ;;  %vm47_vm2 = vweird.f32 %v40_v6  ;;  %vm36_vm6 = vweird.f32 %v29_v23 }
  0x81   :  { %v121_v7 = vpop.eup %120 }
  0x82   :  { %v42_v8 = vmul.f32 %v121_v7, %v40_v6  ;;  %vm48_vm1 = vweird.f32 %v121_v7 }
  0x83   :  { %vm49_vm3 = vmor %vm47_vm2, %vm48_vm1 }
  0x84   :  { %v43_v9 = vmul.f32 %v121_v7, %v42_v8 }
  0x86   :  { %v44_v10 = vmul.f32 0.5, %v43_v9 }
  0x88   :  { %v45_v11 = vsub.f32 1.5, %v44_v10 }
  0x8a   :  { %v46_v12 = vmul.f32 %v121_v7, %v45_v11 }
  0x8b   :  { %v18_v18 = vpop.permute.xlu0 %17 }
  0x8c   :  { %v50_v13 = vsel %vm49_vm3, %v121_v7, %v46_v12  ;;  %vm19_vm4 = vcmp.eq.s32.totalorder %v15_v17, %v18_v18 }
  0x8d   :  { %v53_v14 = vmul.f32 %v50_v13, %v12_v0  ;;  %v20_v21 = vsel %vm19_vm4, %v12_v0, 0.0 }
  0x8e   :  { %v22_v22 = vsel %vm21_vm0, %v20_v21, 0.0 }
  0x8f   :  { %v54_v15 = vmul.f32 1.442695, %v53_v14 }
  0x91   :  { %122 = vpow2.f32 %v54_v15 }
  0x92   :  { %124 = vrsqrt.f32 %v29_v23 }
  0x97   :  { %v123_v19 = vpop.eup %122 }
  0x98   :  { %v56_v20 = vsel %vm21_vm0, %v123_v19, 0.0  ;;  %v125_v24 = vpop.eup %124 }
  0x99   :  { %57 = vadd.xlane.f32.xlu1 %v56_v20  ;;  %v31_v25 = vmul.f32 %v125_v24, %v29_v23  ;;  %vm37_vm5 = vweird.f32 %v125_v24 }
  0x9a   :  { %vm38_vm7 = vmor %vm36_vm6, %vm37_vm5 }
  0x9b   :  { %v32_v26 = vmul.f32 %v125_v24, %v31_v25 }
  0x9d   :  { %v33_v27 = vmul.f32 0.5, %v32_v26 }
  0x9f   :  { %v34_v29 = vsub.f32 1.5, %v33_v27 }
  0xa1   :  { %23 = vadd.xlane.f32.xlu1 %v22_v22  ;;  %v35_v30 = vmul.f32 %v125_v24, %v34_v29 }
  0xa3   :  { %v39_v33 = vsel %vm38_vm7, %v125_v24, %v35_v30 }
 0x10c   :  { %v58_v28 = vpop.xlane.xlu1 %57 }
 0x10d   :  { %126 = vlog2.f32 %v58_v28 }
 0x113   :  { %v127_v31 = vpop.eup %126 }
 0x114   :  { %v61_v32 = vmul.f32 0.6931472, %v127_v31  ;;  %v24_v34 = vpop.xlane.xlu1 %23 }
 0x115   :  { %v51_v35 = vmul.f32 %v39_v33, %v24_v34  ;;  %v59_v36 = vmul.f32 %v50_v13, %v24_v34 }
 0x117   :  { %v52_v37 = vsub.f32 1.0, %v51_v35  ;;  %v62_v38 = vsub.f32 %v61_v32, %v59_v36 }
 0x119   :  { %v63_v39 = vsub.f32 0.0, %v62_v38  ;;  %v70_v40 = vsel %vm69_vm8, %v52_v37, 0.0 }
 0x11a   :  { %71 = vadd.xlane.f32.xlu2 %v70_v40 }
 0x11b   :  { %v64_v41 = vmul.f32 1.442695, %v63_v39 }
 0x11d   :  { %128 = vpow2.f32 %v64_v41 }
 0x123   :  { %v129_v42 = vpop.eup %128 }
 0x124   :  { %v66_v43 = vsub.f32 1.0, %v129_v42 }
 0x126   :  { %v67_v44 = vmul.f32 %v66_v43, %v66_v43 }
 0x128   :  { %v68_v45 = vmul.f32 %v67_v44, %v62_v38 }
 0x12a   :  { %v80_v46 = vsel %vm69_vm8, %v68_v45, 0.0 }
 0x12b   :  { %81 = vadd.xlane.f32.xlu2 %v80_v46 }
 0x18d   :  { %v72_v47 = vpop.xlane.xlu2 %71 }
 0x18e   :  { %v73_v48 = vrot.slane %v72_v47, 4 }
 0x190   :  { %v74_v49 = vadd.f32 %v73_v48, %v72_v47 }
 0x192   :  { %v75_v50 = vrot.slane %v74_v49, 2 }
 0x194   :  { %v76_v51 = vadd.f32 %v75_v50, %v74_v49 }
 0x196   :  { %v77_v52 = vrot.slane %v76_v51, 1 }
 0x198   :  { %v78_v53 = vadd.f32 %v77_v52, %v76_v51 }
 0x19a   :  { %113 = vpush %v78_v53 }
 0x19e   :  { %v82_v54 = vpop.xlane.xlu2 %81 }
 0x19f   :  { %v83_v55 = vrot.slane %v82_v54, 4 }
 0x1a1   :  { %v84_v56 = vadd.f32 %v83_v55, %v82_v54 }
 0x1a3   :  { %v85_v57 = vrot.slane %v84_v56, 2 }
 0x1a5   :  { %v86_v58 = vadd.f32 %v85_v57, %v84_v56 }
 0x1a7   :  { %v87_v59 = vrot.slane %v86_v58, 1 }
 0x1a9   :  { %v88_v60 = vadd.f32 %v87_v59, %v86_v58 }
 0x1ab   :  { %115 = vpush %v88_v60 }
 0x1cb   :  { %s114_s13 = spop %113 }
 0x1cc   :  { %v93_v62 = vstv %s114_s13 }
 0x1dc   :  { %s116_s17 = spop %115 }
 0x1dd   :  { %v94_v63 = vstv %s116_s17 }
 0x1de   :  { %v95_v0 = vsel %vm92_vm9, %v93_v62, %v94_v63 }
 0x1df   :  { %96 = vst [vmem:[#allocation2] sm:$0x3] %v95_v0 }
 0x1e0   :  { %107 = dma.vmem_to_hbm [thread:$0]  %s103_s1, 32, %s105_s16, [#allocation3]  }
 0x1e1   :  { %154 = dma.done.wait [#allocation3], 32  }
 0x1e2   :  { %155 = vsyncadd [#allocation3], 4294967264 }
 0x1e3   :  { %112 = vsyncpa [#allocation3], 1 }

</bundles_post_ra>
